<compile_context>
chip_gen: v7x
topology: tpu7x:2x2x1
jax: 0.10.0
libtpu: 0.0.40
codegen_flags: <defaults>
</compile_context>

<pallas_src>
import functools

import jax
import jax.numpy as jnp
from jax import lax
from jax.experimental import pallas as pl
from jax.experimental.pallas import tpu as pltpu


def _switch_gate_kernel(x_ref, w_ref, b_ref, out_ref, acc_ref, *,
                        topk, capacity, epsilon):
    """One (seq-tile, D-chunk) grid step of the SwitchGate forward.

    x_ref:   (B, tS, tD)    activation tile (full batch, one D chunk).
    w_ref:   (tD, E)        gate-weight chunk.
    b_ref:   (1, E)         gate bias (f32).
    out_ref: (B, E, tS)     gate scores — experts on sublanes, seq on lanes.
    acc_ref: (B*tS, E) f32  logits accumulator across D chunks.
    """
    B, tS, tD = x_ref.shape
    E = w_ref.shape[1]
    k = pl.program_id(1)

    # ---- init / accumulate partial logits on the MXU -------------------------
    @pl.when(k == 0)
    def _init():
        acc_ref[...] = jnp.zeros_like(acc_ref)

    x2 = x_ref[...].reshape(B * tS, tD)                # layout-preserving reshape
    acc_ref[...] += jnp.dot(x2, w_ref[...], preferred_element_type=jnp.float32)

    # ---- finalize softmax / top-k / normalisation on the last D chunk --------
    @pl.when(k == pl.num_programs(1) - 1)
    def _finalize():
        logits = acc_ref[...] + b_ref[...].astype(jnp.float32)       # (B*tS, E)
        # Re-layout the tiny logits tile: experts -> sublanes, seq -> lanes, so
        # every following VPU/EUP op and the single output store are lane-dense.
        g = jnp.transpose(logits.reshape(B, tS, E), (0, 2, 1))       # (B, E, tS) f32

        # softmax over experts (axis=1), vectorized on the whole tile
        m = jnp.max(g, axis=1, keepdims=True)                        # (B, 1, tS)
        p = jnp.exp(g - m)
        inv_tot = pl.reciprocal(jnp.sum(p, axis=1, keepdims=True), approx=True)
        gates = p * inv_tot                                          # (B, E, tS)

        # top-k keep mask via pairwise ranking (pure VPU, vectorized over the full
        # (B, E, tS) tile).  Expert e is kept iff fewer than `topk` experts beat
        # it, where j beats e when g_j > g_e, or g_j == g_e and j < e
        # (first-occurrence tie-break, identical to iterative argmax).  Ranking
        # logits orders the same as ranking gates (softmax is strictly monotone).
        e_idx = lax.broadcasted_iota(jnp.int32, (1, E, 1), 1)
        rank = jnp.zeros(g.shape, dtype=jnp.int32)
        for j in range(E):                                           # E is tiny
            gj = g[:, j:j + 1, :]                                    # (B, 1, tS)
            beats = (gj > g) | ((gj == g) & (j < e_idx))
            rank = rank + beats.astype(jnp.int32)
        keep = rank < topk

        # mask, batch-sum normalisation, capacity scaling — one dense store
        masked = jnp.where(keep, gates, 0.0)                         # (B, E, tS)
        denom = jnp.sum(masked, axis=0, keepdims=True) + jnp.float32(epsilon)
        scale = jnp.float32(capacity) * pl.reciprocal(denom, approx=True)
        out_ref[...] = (masked * scale).astype(out_ref.dtype)


def _vmem_capacity_bytes():
    """Chip-aware VMEM capacity; conservative per-TensorCore cap on v7x."""
    cap = None
    try:
        cap = int(pltpu.get_tpu_info().vmem_capacity_bytes)
    except Exception:
        cap = None
    kind = ""
    try:
        kind = jax.devices()[0].device_kind.lower()
    except Exception:
        pass
    if cap is None:
        cap = (64 << 20) if "v7" in kind else (128 << 20)    # v5e/v6e: 128 MiB
    if "v7" in kind:
        cap = min(cap, 64 << 20)      # make sure we budget per-TC, not per-chip
    return cap


def _block_footprint(B, ts, td, E, x_item, out_item):
    """Pipelined VMEM footprint of one grid step (with (8,128) tile padding)."""
    lane = 128
    e_sub = ((E + 7) // 8) * 8
    x_bytes = 2 * B * ts * td * x_item            # double-buffered X block (2x, not 3x)
    w_bytes = 2 * td * lane * x_item              # W block, E lane-padded to 128
    out_bytes = 2 * B * e_sub * ts * out_item     # out block, E sublane-padded to 8
    acc_bytes = B * ts * lane * 4                 # f32 logits accumulator (lane-padded)
    tmp_bytes = 8 * B * e_sub * ts * 4            # finalize-phase f32 temporaries
    return x_bytes + w_bytes + out_bytes + acc_bytes + tmp_bytes + (2 << 20)


def _choose_tiles(B, S, D, E, budget, x_item, out_item):
    """Pick (seq_tile, d_tile): lane-dense seq tiles, even step counts preferred
    (v7x 2-TC sharding), D-chunking fallback when full-batch blocks don't fit."""
    seq_cands = [t for t in range(128, S + 1, 128) if S % t == 0] or [S]
    d_cands = [t for t in range(128, D + 1, 128) if D % t == 0]
    if D not in d_cands:
        d_cands = d_cands + [D]

    def fits(ts, td):
        return _block_footprint(B, ts, td, E, x_item, out_item) <= budget

    # 1) full D; prefer even (>=4, then >=2) seq step counts, then any >=2, then max.
    fitting = [t for t in seq_cands if fits(t, D)]
    if fitting:
        even = [t for t in fitting if (S // t) >= 2 and (S // t) % 2 == 0]
        even4 = [t for t in even if (S // t) >= 4]
        if even4:
            return max(even4), D
        if even:
            return max(even), D
        multi = [t for t in fitting if (S // t) >= 2]
        if multi:
            return max(multi), D
        return max(fitting), D

    # 2) full D doesn't fit even at the smallest seq tile: chunk the contraction dim
    #    (accumulate logits across the 'arbitrary' K axis).
    ts = min(seq_cands)
    d_fit = [t for t in d_cands if fits(ts, t)]
    if d_fit:
        return ts, max(d_fit)
    # 3) still nothing: smallest legal blocks; let the compiler cope.
    return ts, min(d_cands)


def switch_gate_forward(x, w, b, *, capacity_factor, epsilon,
                        seq_tile=None, d_tile=None, expert_major=False):
    """SwitchGate forward.

    x: (B, S, D) activations (f32 or bf16 — never upcast here).
    w: (D, E)    gate weight (= nn.Linear(d_model, num_experts).weight.T).
    b: (1, E)    gate bias.
    Returns f32 gate scores of shape (B, S, E) (or (B, E, S) if expert_major).
    """
    B, S, D = x.shape
    E = w.shape[1]
    capacity = int(capacity_factor * B)            # matches the PyTorch module
    topk = E // 2

    w = w.astype(x.dtype)                          # MXU operands in activation dtype
    b = b.astype(jnp.float32)                      # post-matmul math stays f32
    out_dtype = jnp.float32                        # gate scores are tiny; keep f32

    vmem_cap = _vmem_capacity_bytes()
    vmem_limit = int(max(32 << 20, min(3 * vmem_cap // 4, 96 << 20)))
    budget = int(vmem_limit * 0.8)

    x_item = jnp.dtype(x.dtype).itemsize
    out_item = jnp.dtype(out_dtype).itemsize
    ts_auto, td_auto = _choose_tiles(B, S, D, E, budget, x_item, out_item)
    seq_tile = seq_tile or ts_auto
    d_tile = d_tile or td_auto
    assert S % seq_tile == 0 and (seq_tile == S or seq_tile % 128 == 0)
    assert D % d_tile == 0 and (d_tile == D or d_tile % 128 == 0)
    ns, nd = S // seq_tile, D // d_tile

    kernel = functools.partial(_switch_gate_kernel,
                               topk=topk, capacity=capacity, epsilon=epsilon)

    cost = pl.CostEstimate(
        flops=2 * B * S * D * E,
        transcendentals=B * S * E,
        bytes_accessed=B * S * D * x_item + D * E * x_item + B * S * E * out_item)

    out_bes = pl.pallas_call(
        kernel,
        out_shape=jax.ShapeDtypeStruct((B, E, S), out_dtype),
        grid_spec=pltpu.PrefetchScalarGridSpec(
            num_scalar_prefetch=0,
            grid=(ns, nd),                                        # reduction axis last
            in_specs=[
                pl.BlockSpec((B, seq_tile, d_tile), lambda i, k: (0, i, k)),  # X
                pl.BlockSpec((d_tile, E), lambda i, k: (k, 0)),               # gate W
                pl.BlockSpec((1, E), lambda i, k: (0, 0)),                    # gate bias
            ],
            # Lane-dense output: last block dim is the seq tile.
            out_specs=pl.BlockSpec((B, E, seq_tile), lambda i, k: (0, 0, i)),
            scratch_shapes=[pltpu.VMEM((B * seq_tile, E), jnp.float32)],
        ),
        compiler_params=pltpu.CompilerParams(
            dimension_semantics=("parallel", "arbitrary"),
            vmem_limit_bytes=vmem_limit),
        cost_estimate=cost,
    )(x, w, b)

    if expert_major:
        return out_bes                            # (B, E, S) for expert-major dispatch
    # Back to the module's (B, S, E) layout (cheap XLA transpose outside the kernel).
    return jnp.transpose(out_bes, (0, 2, 1))


def switch_gate_reference(x, w, b, *, capacity_factor, epsilon):
    """Pure-JAX reference mirroring the PyTorch SwitchGate.forward."""
    B, S, D = x.shape
    E = w.shape[1]
    topk = E // 2
    capacity = int(capacity_factor * B)

    logits = jnp.einsum("bsd,de->bse", x.astype(jnp.float32), w.astype(jnp.float32)) + b[0]
    gate = jax.nn.softmax(logits, axis=-1)

    # top-k one-hot mask (iterative argmax, first occurrence wins ties)
    lanes = lax.broadcasted_iota(jnp.int32, gate.shape, 2)
    work = gate
    mask = jnp.zeros_like(gate)
    for _ in range(topk):
        idx = jnp.argmax(work, axis=-1)
        sel = lanes == idx[..., None]
        mask = jnp.where(sel, 1.0, mask)
        work = jnp.where(sel, -jnp.inf, work)

    masked = gate * mask
    denom = jnp.sum(masked, axis=0, keepdims=True) + epsilon
    return masked / denom * capacity


if __name__ == "__main__":
    # Module hyper-params (SwitchGate(n_head, d_model, config))
    n_head = 4          # num_experts
    d_model = 32
    config = {"capacity": 1.0, "epsilon": 1e-6}

    batch, seq = 2, 8

    key = jax.random.PRNGKey(0)
    kx, kw, kb = jax.random.split(key, 3)

    # nn.Linear(d_model, n_head) default init: U(-1/sqrt(d_model), 1/sqrt(d_model));
    # weight stored pre-transposed: (d_model, num_experts)
    bound = 1.0 / (d_model ** 0.5)
    w_gate = jax.random.uniform(kw, (d_model, n_head), jnp.float32, -bound, bound)
    b_gate = jax.random.uniform(kb, (1, n_head), jnp.float32, -bound, bound)

    x = jax.random.normal(kx, (batch, seq, d_model), jnp.float32)

    out = switch_gate_forward(
        x, w_gate, b_gate,
        capacity_factor=config["capacity"], epsilon=config["epsilon"])
    out = jax.block_until_ready(out)

    ref = switch_gate_reference(
        x, w_gate, b_gate,
        capacity_factor=config["capacity"], epsilon=config["epsilon"])

    assert out.shape == (batch, seq, n_head)
    # approx EUP reciprocals (~2^-12 rel err) -> loosened tolerance vs f32 reference.
    assert jnp.allclose(out, ref, atol=5e-3, rtol=5e-3), "mismatch vs reference"

    # bf16 activation path (caller contract per perf review): smoke run only —
    # near-tie tokens may legitimately route differently than the f32 reference.
    out_bf16 = switch_gate_forward(
        x.astype(jnp.bfloat16), w_gate, b_gate,
        capacity_factor=config["capacity"], epsilon=config["epsilon"])
    out_bf16 = jax.block_until_ready(out_bf16)
    assert out_bf16.shape == (batch, seq, n_head)
    assert bool(jnp.all(jnp.isfinite(out_bf16)))

    # TODO(synk): PyTorch returns (gate_scores, None); the aux `None` is dropped here.
    print("KERNEL_OK")
</pallas_src>

<mosaic_0001>
module attributes {stable_mosaic.version = 11 : i64} {
  func.func @_switch_gate_kernel(%arg0: i32, %arg1: i32, %arg2: memref<2x8x32xf32, #tpu.memory_space<vmem>>, %arg3: memref<32x4xf32, #tpu.memory_space<vmem>>, %arg4: memref<1x4xf32, #tpu.memory_space<vmem>>, %arg5: memref<2x4x8xf32, #tpu.memory_space<vmem>>, %arg6: memref<16x4xf32, #tpu.memory_space<vmem>>) attributes {dimension_semantics = [#tpu.dimension_semantics<parallel>, #tpu.dimension_semantics<arbitrary>], iteration_bounds = array<i64: 1, 1>, scalar_prefetch = 0 : i64, scratch_operands = 1 : i64, tpu.core_type = #tpu.core_type<tc>, window_params = [{transform_indices = @transform_0, window_bounds = array<i64: 2, 8, 32>}, {transform_indices = @transform_1, window_bounds = array<i64: 32, 4>}, {pipeline_mode = #tpu.pipeline_mode<synchronous>, transform_indices = @transform_2, window_bounds = array<i64: 1, 4>}, {transform_indices = @transform_3, window_bounds = array<i64: 2, 4, 8>}]} {
    %c0_i32 = arith.constant 0 : i32
    %0 = arith.cmpi eq, %arg1, %c0_i32 : i32
    %1 = arith.extui %0 : i1 to i32
    %c0_i32_0 = arith.constant 0 : i32
    %2 = arith.cmpi ne, %1, %c0_i32_0 : i32
    scf.if %2 {
      %cst_11 = arith.constant 0.000000e+00 : f32
      %13 = vector.broadcast %cst_11 : f32 to vector<16x4xf32>
      %c0_12 = arith.constant 0 : index
      %c0_13 = arith.constant 0 : index
      %14 = vector.load %arg6[%c0_12, %c0_13] : memref<16x4xf32, #tpu.memory_space<vmem>>, vector<16x4xf32>
      tpu.vector_store %arg6[%c0_12, %c0_13], %13 {strides = array<i32>} : memref<16x4xf32, #tpu.memory_space<vmem>>, vector<16x4xf32>,
    } else {
    }
    %c0 = arith.constant 0 : index
    %c0_1 = arith.constant 0 : index
    %c0_2 = arith.constant 0 : index
    %3 = vector.load %arg2[%c0, %c0_1, %c0_2] : memref<2x8x32xf32, #tpu.memory_space<vmem>>, vector<2x8x32xf32>
    %4 = vector.shape_cast %3 : vector<2x8x32xf32> to vector<16x32xf32>
    %c0_3 = arith.constant 0 : index
    %c0_4 = arith.constant 0 : index
    %5 = vector.load %arg6[%c0_3, %c0_4] : memref<16x4xf32, #tpu.memory_space<vmem>>, vector<16x4xf32>
    %c0_5 = arith.constant 0 : index
    %c0_6 = arith.constant 0 : index
    %6 = vector.load %arg3[%c0_5, %c0_6] : memref<32x4xf32, #tpu.memory_space<vmem>>, vector<32x4xf32>
    %cst = arith.constant dense<0.000000e+00> : vector<16x4xf32>
    %7 = tpu.matmul %4, %6, %cst {dimension_numbers = #tpu.dot_dimension_numbers<[1], [0], [0], [1], [0, 0, 1, 1], [], []>} : vector<16x32xf32>, vector<32x4xf32>, vector<16x4xf32> -> vector<16x4xf32>
    %8 = arith.addf %5, %7 : vector<16x4xf32>
    %c0_7 = arith.constant 0 : index
    %c0_8 = arith.constant 0 : index
    %9 = vector.load %arg6[%c0_7, %c0_8] : memref<16x4xf32, #tpu.memory_space<vmem>>, vector<16x4xf32>
    tpu.vector_store %arg6[%c0_7, %c0_8], %8 {strides = array<i32>} : memref<16x4xf32, #tpu.memory_space<vmem>>, vector<16x4xf32>,
    %c0_i32_9 = arith.constant 0 : i32
    %10 = arith.cmpi eq, %arg1, %c0_i32_9 : i32
    %11 = arith.extui %10 : i1 to i32
    %c0_i32_10 = arith.constant 0 : i32
    %12 = arith.cmpi ne, %11, %c0_i32_10 : i32
    scf.if %12 {
      %c0_11 = arith.constant 0 : index
      %c0_12 = arith.constant 0 : index
      %13 = vector.load %arg6[%c0_11, %c0_12] : memref<16x4xf32, #tpu.memory_space<vmem>>, vector<16x4xf32>
      %c0_13 = arith.constant 0 : index
      %c0_14 = arith.constant 0 : index
      %14 = vector.load %arg4[%c0_13, %c0_14] : memref<1x4xf32, #tpu.memory_space<vmem>>, vector<1x4xf32>
      %15 = vector.broadcast %14 : vector<1x4xf32> to vector<16x4xf32>
      %16 = arith.addf %13, %15 : vector<16x4xf32>
      %17 = vector.shape_cast %16 : vector<16x4xf32> to vector<2x8x4xf32>
      %18 = tpu.transpose %17, [0, 2, 1] : vector<2x8x4xf32> -> vector<2x4x8xf32>
      %cst_15 = arith.constant dense<0xFF800000> : vector<2x8xf32>
      %19 = vector.multi_reduction <maximumf>, %18, %cst_15 [1] : vector<2x4x8xf32> to vector<2x8xf32>
      %20 = vector.shape_cast %19 : vector<2x8xf32> to vector<2x1x8xf32>
      %21 = vector.broadcast %20 : vector<2x1x8xf32> to vector<2x4x8xf32>
      %22 = arith.subf %18, %21 : vector<2x4x8xf32>
      %23 = math.exp %22 : vector<2x4x8xf32>
      %cst_16 = arith.constant dense<0.000000e+00> : vector<2x8xf32>
      %24 = vector.multi_reduction <add>, %23, %cst_16 [1] : vector<2x4x8xf32> to vector<2x8xf32>
      %25 = vector.shape_cast %24 : vector<2x8xf32> to vector<2x1x8xf32>
      %26 = tpu.reciprocal %25 {approx = true} : vector<2x1x8xf32> -> vector<2x1x8xf32>
      %27 = vector.broadcast %26 : vector<2x1x8xf32> to vector<2x4x8xf32>
      %28 = arith.mulf %23, %27 : vector<2x4x8xf32>
      %29 = tpu.iota {dimensions = array<i32: 1>} : vector<1x4x1xi32>
      %c0_i32_17 = arith.constant 0 : i32
      %30 = vector.broadcast %c0_i32_17 : i32 to vector<2x4x8xi32>
      %31 = vector.extract_strided_slice %18 {offsets = [0, 0, 0], sizes = [2, 1, 8], strides = [1, 1, 1]} : vector<2x4x8xf32> to vector<2x1x8xf32>
      %32 = vector.broadcast %31 : vector<2x1x8xf32> to vector<2x4x8xf32>
      %33 = arith.cmpf ogt, %32, %18 : vector<2x4x8xf32>
      %34 = vector.broadcast %31 : vector<2x1x8xf32> to vector<2x4x8xf32>
      %35 = arith.cmpf oeq, %34, %18 : vector<2x4x8xf32>
      %c0_i32_18 = arith.constant 0 : i32
      %36 = vector.broadcast %c0_i32_18 : i32 to vector<1x4x1xi32>
      %37 = arith.cmpi sgt, %29, %36 : vector<1x4x1xi32>
      %38 = vector.broadcast %37 : vector<1x4x1xi1> to vector<2x4x8xi1>
      %39 = arith.andi %35, %38 : vector<2x4x8xi1>
      %40 = arith.ori %33, %39 : vector<2x4x8xi1>
      %41 = arith.extui %40 : vector<2x4x8xi1> to vector<2x4x8xi32>
      %42 = arith.addi %30, %41 : vector<2x4x8xi32>
      %43 = vector.extract_strided_slice %18 {offsets = [0, 1, 0], sizes = [2, 1, 8], strides = [1, 1, 1]} : vector<2x4x8xf32> to vector<2x1x8xf32>
      %44 = vector.broadcast %43 : vector<2x1x8xf32> to vector<2x4x8xf32>
      %45 = arith.cmpf ogt, %44, %18 : vector<2x4x8xf32>
      %46 = vector.broadcast %43 : vector<2x1x8xf32> to vector<2x4x8xf32>
      %47 = arith.cmpf oeq, %46, %18 : vector<2x4x8xf32>
      %c1_i32 = arith.constant 1 : i32
      %48 = vector.broadcast %c1_i32 : i32 to vector<1x4x1xi32>
      %49 = arith.cmpi sgt, %29, %48 : vector<1x4x1xi32>
      %50 = vector.broadcast %49 : vector<1x4x1xi1> to vector<2x4x8xi1>
      %51 = arith.andi %47, %50 : vector<2x4x8xi1>
      %52 = arith.ori %45, %51 : vector<2x4x8xi1>
      %53 = arith.extui %52 : vector<2x4x8xi1> to vector<2x4x8xi32>
      %54 = arith.addi %42, %53 : vector<2x4x8xi32>
      %55 = vector.extract_strided_slice %18 {offsets = [0, 2, 0], sizes = [2, 1, 8], strides = [1, 1, 1]} : vector<2x4x8xf32> to vector<2x1x8xf32>
      %56 = vector.broadcast %55 : vector<2x1x8xf32> to vector<2x4x8xf32>
      %57 = arith.cmpf ogt, %56, %18 : vector<2x4x8xf32>
      %58 = vector.broadcast %55 : vector<2x1x8xf32> to vector<2x4x8xf32>
      %59 = arith.cmpf oeq, %58, %18 : vector<2x4x8xf32>
      %c2_i32 = arith.constant 2 : i32
      %60 = vector.broadcast %c2_i32 : i32 to vector<1x4x1xi32>
      %61 = arith.cmpi sgt, %29, %60 : vector<1x4x1xi32>
      %62 = vector.broadcast %61 : vector<1x4x1xi1> to vector<2x4x8xi1>
      %63 = arith.andi %59, %62 : vector<2x4x8xi1>
      %64 = arith.ori %57, %63 : vector<2x4x8xi1>
      %65 = arith.extui %64 : vector<2x4x8xi1> to vector<2x4x8xi32>
      %66 = arith.addi %54, %65 : vector<2x4x8xi32>
      %67 = vector.extract_strided_slice %18 {offsets = [0, 3, 0], sizes = [2, 1, 8], strides = [1, 1, 1]} : vector<2x4x8xf32> to vector<2x1x8xf32>
      %68 = vector.broadcast %67 : vector<2x1x8xf32> to vector<2x4x8xf32>
      %69 = arith.cmpf ogt, %68, %18 : vector<2x4x8xf32>
      %70 = vector.broadcast %67 : vector<2x1x8xf32> to vector<2x4x8xf32>
      %71 = arith.cmpf oeq, %70, %18 : vector<2x4x8xf32>
      %c3_i32 = arith.constant 3 : i32
      %72 = vector.broadcast %c3_i32 : i32 to vector<1x4x1xi32>
      %73 = arith.cmpi sgt, %29, %72 : vector<1x4x1xi32>
      %74 = vector.broadcast %73 : vector<1x4x1xi1> to vector<2x4x8xi1>
      %75 = arith.andi %71, %74 : vector<2x4x8xi1>
      %76 = arith.ori %69, %75 : vector<2x4x8xi1>
      %77 = arith.extui %76 : vector<2x4x8xi1> to vector<2x4x8xi32>
      %78 = arith.addi %66, %77 : vector<2x4x8xi32>
      %c2_i32_19 = arith.constant 2 : i32
      %79 = vector.broadcast %c2_i32_19 : i32 to vector<2x4x8xi32>
      %80 = arith.cmpi slt, %78, %79 : vector<2x4x8xi32>
      %cst_20 = arith.constant 0.000000e+00 : f32
      %81 = vector.broadcast %cst_20 : f32 to vector<2x4x8xf32>
      %82 = arith.select %80, %28, %81 : vector<2x4x8xi1>, vector<2x4x8xf32>
      %cst_21 = arith.constant dense<0.000000e+00> : vector<4x8xf32>
      %83 = vector.multi_reduction <add>, %82, %cst_21 [0] : vector<2x4x8xf32> to vector<4x8xf32>
      %84 = vector.shape_cast %83 : vector<4x8xf32> to vector<1x4x8xf32>
      %cst_22 = arith.constant 9.99999997E-7 : f32
      %85 = vector.broadcast %cst_22 : f32 to vector<1x4x8xf32>
      %86 = arith.addf %84, %85 : vector<1x4x8xf32>
      %87 = tpu.reciprocal %86 {approx = true} : vector<1x4x8xf32> -> vector<1x4x8xf32>
      %cst_23 = arith.constant 2.000000e+00 : f32
      %88 = vector.broadcast %cst_23 : f32 to vector<1x4x8xf32>
      %89 = arith.mulf %88, %87 : vector<1x4x8xf32>
      %90 = vector.broadcast %89 : vector<1x4x8xf32> to vector<2x4x8xf32>
      %91 = arith.mulf %82, %90 : vector<2x4x8xf32>
      %c0_24 = arith.constant 0 : index
      %c0_25 = arith.constant 0 : index
      %c0_26 = arith.constant 0 : index
      %92 = vector.load %arg5[%c0_24, %c0_25, %c0_26] : memref<2x4x8xf32, #tpu.memory_space<vmem>>, vector<2x4x8xf32>
      tpu.vector_store %arg5[%c0_24, %c0_25, %c0_26], %91 {strides = array<i32>} : memref<2x4x8xf32, #tpu.memory_space<vmem>>, vector<2x4x8xf32>,
    } else {
    }
    return
  }
  func.func @transform_0(%arg0: i32, %arg1: i32) -> (i32, i32, i32) {
    %c0_i32 = arith.constant 0 : i32
    %c0_i32_0 = arith.constant 0 : i32
    return %c0_i32, %arg0, %arg1 : i32, i32, i32
  }
  func.func @transform_1(%arg0: i32, %arg1: i32) -> (i32, i32) {
    %c0_i32 = arith.constant 0 : i32
    %c0_i32_0 = arith.constant 0 : i32
    return %arg1, %c0_i32 : i32, i32
  }
  func.func @transform_2(%arg0: i32, %arg1: i32) -> (i32, i32) {
    %c0_i32 = arith.constant 0 : i32
    %c0_i32_0 = arith.constant 0 : i32
    %c0_i32_1 = arith.constant 0 : i32
    return %c0_i32, %c0_i32_0 : i32, i32
  }
  func.func @transform_3(%arg0: i32, %arg1: i32) -> (i32, i32, i32) {
    %c0_i32 = arith.constant 0 : i32
    %c0_i32_0 = arith.constant 0 : i32
    %c0_i32_1 = arith.constant 0 : i32
    return %c0_i32, %c0_i32_0, %arg0 : i32, i32, i32
  }
}

</mosaic_0001>

<bundles_post_ra>
// kernel: tpu_custom_call.1
= control target key start
LH: loop header
LB: loop body
LE: loop exit
PB: predicated region body
PF: predicated region fallthrough
CT: control target
= control target key end

     0   :  { %8 = vsyncpa [#allocation4], 0  ;;  %s708_s0 = inlined_call_operand.hbm [shape: f32[2,8,32], index: 0, kind: input, shape index: {}]   ;;  %s709_s1 = inlined_call_operand.hbm [shape: f32[32,4], index: 1, kind: input, shape index: {}]   ;;  %s710_s2 = inlined_call_operand.hbm [shape: f32[1,4], index: 2, kind: input, shape index: {}]   ;;  %s711_s3 = inlined_call_operand.hbm [shape: f32[2,4,8], index: 3, kind: output, shape index: {}]  }
   0x1   :  { %9 = vsyncpa [#allocation7], 0 }
   0x2   :  { %10 = vsyncpa [#allocation5], 0  ;;  %s539_s12 = smov [#allocation6]   ;;  %s540_s14 = smov [#allocation3]  }
   0x3   :  { %s28_s13 = sshll.u32 %s539_s12, 4  ;;  %s16_s15 = sshll.u32 %s540_s14, 4  ;;  %s29_s13 = int_to_ptr.vmem [resolvable:$true] %s28_s13  ;;  %s569_s15 = int_to_ptr.vmem [resolvable:$true] %s16_s15 }
   0x4   :  { %s445_s18 = scalar_lea.hbm %s709_s1, 512 }
   0x5   :  { %p446_p0 = scmp.ne.s32.totalorder %s709_s1, %s445_s18  ;;  %p449_p1 = scmp.lt.u32.totalorder %s445_s18, %s709_s1 }
   0x7   :  { %p451_p2 = pnand %p449_p1, %p446_p0 }
   0x9   :  { %454 = shalt.err (!%p451_p2)
}
   0xa   :  { %s455_s23 = scalar_lea.vmem %s29_s13, 512  ;;  %p460_p4 = scmp.lt.s32.totalorder %s29_s13, %s29_s13 }
   0xb   :  { %p456_p3 = scmp.ne.s32.totalorder %s29_s13, %s455_s23  ;;  %p461_p5 = scmp.lt.s32.totalorder %s455_s23, %s455_s23 }
   0xd   :  { %p462_p6 = por %p461_p5, %p460_p4 }
   0xf   :  { %p463_p7 = pnand %p462_p6, %p456_p3 }
  0x11   :  { %466 = shalt.err (!%p463_p7)
}
  0x12   :  { %s541_s24 = smov 128   ;;  %s542_s25 = smov 8  }
  0x13   :  { %34 = dma.hbm_to_vmem [thread:$0]  %s709_s1, 512, %s29_s13, [#allocation7], %s541_s24, %s541_s24, %s542_s25  }
  0x14   :  { %s467_s30 = scalar_lea.hbm %s708_s0, 256 }
  0x15   :  { %p468_p8 = scmp.ne.s32.totalorder %s708_s0, %s467_s30  ;;  %p471_p9 = scmp.lt.u32.totalorder %s467_s30, %s708_s0 }
  0x17   :  { %p473_p10 = pnand %p471_p9, %p468_p8 }
  0x19   :  { %476 = shalt.err (!%p473_p10)
}
  0x1a   :  { %s477_s8 = scalar_lea.vmem %s569_s15, 256  ;;  %p482_p12 = scmp.lt.s32.totalorder %s569_s15, %s569_s15 }
  0x1b   :  { %p478_p11 = scmp.ne.s32.totalorder %s569_s15, %s477_s8  ;;  %p483_p13 = scmp.lt.s32.totalorder %s477_s8, %s477_s8 }
  0x1d   :  { %p484_p0 = por %p483_p13, %p482_p12 }
  0x1f   :  { %p485_p1 = pnand %p484_p0, %p478_p11 }
  0x21   :  { %488 = shalt.err (!%p485_p1)
}
  0x22   :  { %22 = dma.hbm_to_vmem [thread:$0]  %s708_s0, 256, %s569_s15, [#allocation4], %s541_s24, %s541_s24, %s542_s25  }
  0x23   :  { %s543_s10 = smov [#allocation8]   ;;  %s489_s14 = scalar_lea.hbm %s710_s2, 16 }
  0x24   :  { %s41_s11 = sshll.u32 %s543_s10, 4  ;;  %p490_p2 = scmp.ne.s32.totalorder %s710_s2, %s489_s14  ;;  %s42_s11 = int_to_ptr.vmem [resolvable:$true] %s41_s11 }
  0x25   :  { %p493_p3 = scmp.lt.u32.totalorder %s489_s14, %s710_s2 }
  0x27   :  { %p495_p4 = pnand %p493_p3, %p490_p2 }
  0x29   :  { %498 = shalt.err (!%p495_p4)
}
  0x2a   :  { %s499_s20 = scalar_lea.vmem %s42_s11, 16  ;;  %s503_s0 = scalar_lea.vmem %s42_s11, 32 }
  0x2b   :  { %p500_p5 = scmp.ne.s32.totalorder %s42_s11, %s499_s20  ;;  %p504_p6 = scmp.lt.s32.totalorder %s42_s11, %s42_s11 }
  0x2c   :  { %p505_p7 = scmp.lt.s32.totalorder %s503_s0, %s499_s20 }
  0x2e   :  { %p506_p8 = por %p505_p7, %p504_p6 }
  0x30   :  { %p507_p9 = pnand %p506_p8, %p500_p5 }
  0x32   :  { %510 = shalt.err (!%p507_p9)
}
  0x33   :  { %44 = dma.hbm_to_vmem [thread:$0]  %s710_s2, 16, %s42_s11, [#allocation7]  }
  0x34   :  { %533 = dma.done.wait [#allocation4], 256  }
  0x35   :  { %534 = vsyncadd [#allocation4], 4294967040 }
  0x36   :  { %535 = dma.done.wait [#allocation7], 528  }
  0x37   :  { %536 = vsyncadd [#allocation7], 4294966768  ;;  %vm58_vm0 = vcmask 31744   ;;  %v544_v0 = vmov 0.0   ;;  %vm69_vm1 = vcmask 261120   ;;  %v65_v1 = vld [vmem:[#allocation6] sm:$0xff]  ;;  %v273_v34 = vlaneseq }
  0x38   :  { %60 = vst.msk [vmem:[#allocation2 + $0x8] sm:$0xff] %vm58_vm0, %v544_v0  ;;  %59 = vst.msk [vmem:[#allocation2] sm:$0xff] %vm58_vm0, %v544_v0  ;;  %v66_v2 = vld [vmem:[#allocation6 + $0x8] sm:$0xff]  ;;  %v67_v3 = vld [vmem:[#allocation6 + $0x10] sm:$0xff]  ;;  %vm234_vm2 = vcmask 60416   ;;  %s546_s2 = smov [#allocation9]  }
  0x39   :  { %v417_v4 = vpack.c.bf16 %v66_v2, %v65_v1  ;;  %v68_v5 = vld [vmem:[#allocation6 + $0x18] sm:$0xff]  ;;  %v61_v6 = vld [vmem:[#allocation3] sm:$0xff]  ;;  %v399_v15 = vld [vmem:[#allocation8] ss:$0 sm:$0xff]  ;;  %v625_v39 = vshrl.u32 %v273_v34, 7  ;;  %s384_s22 = sshll.u32 %s546_s2, 4  ;;  %s385_s22 = int_to_ptr.vmem [resolvable:$true] %s384_s22 }
  0x3a   :  { %v421_v7 = vpack.c.bf16 %v68_v5, %v67_v3  ;;  %414 = vmatprep.mubr.msk.f32.mxu0 %vm69_vm1, %v61_v6  ;;  %v62_v8 = vld [vmem:[#allocation3 + $0x8] sm:$0xff]  ;;  %v545_v5 = vmov 0   ;;  %s511_s23 = scalar_lea.vmem %s385_s22, 128  ;;  %p516_p11 = scmp.lt.s32.totalorder %s385_s22, %s385_s22 }
  0x3b   :  { %418 = vmatprep.subr.bf16.mxu0 %v417_v4  ;;  %v277_v42 = vsub.s32 0, %v625_v39  ;;  %v298_v44 = vsub.s32 1, %v625_v39  ;;  %vm287_vm4 = vcmp.gt.s32.totalorder %v625_v39, 0  ;;  %v321_v51 = vsub.s32 2, %v625_v39  ;;  %p512_p10 = scmp.ne.s32.totalorder %s385_s22, %s511_s23  ;;  %p517_p12 = scmp.lt.s32.totalorder %s511_s23, %s511_s23 }
  0x3c   :  { %420 = vmatpush3.bf16.msra.mxu0 %v417_v4  ;;  %vm308_vm8 = vcmp.gt.s32.totalorder %v625_v39, 1  ;;  %v344_v55 = vsub.s32 3, %v625_v39 }
  0x3d   :  { %422 = vmatprep.subr.bf16.mxu0 %v421_v7  ;;  %p518_p13 = por %p517_p12, %p516_p11 }
  0x3f   :  { %v64_v9 = vld [vmem:[#allocation2 + $0x8] sm:$0xff]  ;;  %v63_v10 = vld [vmem:[#allocation2] sm:$0xff]  ;;  %p519_p0 = pnand %p518_p13, %p512_p10 }
  0x40   :  { %424 = vmatpush3.bf16.msra.mxu0 %v421_v7 }
  0x43   :  { %415 = vmatmul.mubr.msk.f32.vlgmr.msra.gmra.mrb[0].mxu0 %vm69_vm1, %v62_v8 }
 0x116   :  { %v416_v11 = vpop.f32.mrb[0].mxu0 }
 0x117   :  { %v152_v12 = vadd.f32 %v416_v11, %v64_v9  ;;  %v142_v13 = vpop.f32.mrb[1].mxu0 }
 0x118   :  { %v151_v14 = vadd.f32 %v142_v13, %v63_v10 }
 0x119   :  { %155 = vst.msk [vmem:[#allocation2 + $0x8] sm:$0xff] %vm58_vm0, %v152_v12 }
 0x11a   :  { %154 = vst.msk [vmem:[#allocation2] sm:$0xff] %vm58_vm0, %v151_v14 }
 0x120   :  { %v160_v18 = vld [vmem:[#allocation2 + $0x8] sm:$0xff] }
 0x121   :  { %v159_v16 = vld [vmem:[#allocation2] sm:$0xff]  ;;  %v169_v19 = vadd.f32 %v399_v15, %v160_v18 }
 0x122   :  { %v168_v17 = vadd.f32 %v399_v15, %v159_v16 }
 0x124   :  { %170 = vxpose.xlu0.b32.start.end [1/1] (short) (narrow) %v168_v17, 8 }
 0x128   :  { %202 = vxpose.xlu0.b32.start.end [1/1] (short) (narrow) %v169_v19, 8 }
 0x1a4   :  { %v616_v20 = vpop.trf.xlu0 }
 0x1a5   :  { %v235_v21 = vsel %vm234_vm2, %v616_v20, -inf  ;;  %v278_v43 = vrot.slane %v616_v20, %v277_v42  ;;  %v299_v46 = vrot.slane %v616_v20, %v298_v44  ;;  %v322_v59 = vrot.slane %v616_v20, %v321_v51 }
 0x1a6   :  { %v236_v22 = vrot.slane %v235_v21, 4  ;;  %v345_v1 = vrot.slane %v616_v20, %v344_v55 }
 0x1a7   :  { %vm285_vm3 = vcmp.eq.f32.partialorder %v278_v43, %v616_v20  ;;  %vm283_vm5 = vcmp.gt.f32.partialorder %v278_v43, %v616_v20  ;;  %vm306_vm7 = vcmp.eq.f32.partialorder %v299_v46, %v616_v20  ;;  %vm304_vm12 = vcmp.gt.f32.partialorder %v299_v46, %v616_v20 }
 0x1a8   :  { %v620_v23 = vpop.trf.xlu0  ;;  %v237_v24 = vmax.f32 %v235_v21, %v236_v22  ;;  %vm290_vm6 = vmand %vm285_vm3, %vm287_vm4  ;;  %vm331_vm3 = vcmp.gt.s32.totalorder %v625_v39, 2 }
 0x1a9   :  { %v242_v25 = vsel %vm234_vm2, %v620_v23, -inf  ;;  %v282_v48 = vrot.slane %v620_v23, %v277_v42  ;;  %v303_v50 = vrot.slane %v620_v23, %v298_v44  ;;  %vm652_vm10 = vmor %vm283_vm5, %vm290_vm6  ;;  %v326_v62 = vrot.slane %v620_v23, %v321_v51 }
 0x1aa   :  { %v238_v26 = vrot.slane %v237_v24, 2  ;;  %v243_v27 = vrot.slane %v242_v25, 4  ;;  %vm311_vm13 = vmand %vm306_vm7, %vm308_vm8  ;;  %vm329_vm6 = vcmp.eq.f32.partialorder %v322_v59, %v616_v20  ;;  %v349_v4 = vrot.slane %v620_v23, %v344_v55 }
 0x1ab   :  { %vm286_vm9 = vcmp.eq.f32.partialorder %v282_v48, %v620_v23  ;;  %vm307_vm11 = vcmp.eq.f32.partialorder %v303_v50, %v620_v23  ;;  %vm284_vm14 = vcmp.gt.f32.partialorder %v282_v48, %v620_v23  ;;  %vm305_vm0 = vcmp.gt.f32.partialorder %v303_v50, %v620_v23  ;;  %vm313_vm5 = vmor %vm304_vm12, %vm311_vm13 }
 0x1ac   :  { %v239_v28 = vmax.f32 %v237_v24, %v238_v26  ;;  %v244_v29 = vmax.f32 %v242_v25, %v243_v27  ;;  %vm291_vm15 = vmand %vm286_vm9, %vm287_vm4  ;;  %vm330_vm9 = vcmp.eq.f32.partialorder %v326_v62, %v620_v23  ;;  %v294_v6 = vsel %vm652_vm10, 1, %v545_v5 }
 0x1ad   :  { %vm312_vm1 = vmand %vm307_vm11, %vm308_vm8  ;;  %v315_v7 = vsel %vm313_vm5, 1, %v545_v5  ;;  %vm327_vm8 = vcmp.gt.f32.partialorder %v322_v59, %v616_v20  ;;  %vm352_vm12 = vcmp.eq.f32.partialorder %v345_v1, %v616_v20  ;;  %vm354_vm13 = vcmp.gt.s32.totalorder %v625_v39, 3 }
 0x1ae   :  { %v240_v30 = vrot.slane %v239_v28, 1  ;;  %v245_v31 = vrot.slane %v244_v29, 2  ;;  %vm293_vm7 = vmor %vm284_vm14, %vm291_vm15  ;;  %vm328_vm14 = vcmp.gt.f32.partialorder %v326_v62, %v620_v23  ;;  %v317_v12 = vadd.s32 %v315_v7, %v294_v6 }
 0x1af   :  { %vm314_vm4 = vmor %vm305_vm0, %vm312_vm1  ;;  %v295_v9 = vsel %vm293_vm7, 1, %v545_v5  ;;  %vm353_vm0 = vcmp.eq.f32.partialorder %v349_v4, %v620_v23  ;;  %vm350_vm1 = vcmp.gt.f32.partialorder %v345_v1, %v616_v20  ;;  %vm351_vm7 = vcmp.gt.f32.partialorder %v349_v4, %v620_v23 }
 0x1b0   :  { %v241_v32 = vmax.f32 %v239_v28, %v240_v30  ;;  %v246_v33 = vmax.f32 %v244_v29, %v245_v31  ;;  %vm334_vm11 = vmand %vm329_vm6, %vm331_vm3  ;;  %v316_v10 = vsel %vm314_vm4, 1, %v545_v5 }
 0x1b1   :  { %vm335_vm15 = vmand %vm330_vm9, %vm331_vm3  ;;  %v318_v13 = vadd.s32 %v316_v10, %v295_v9 }
 0x1b2   :  { %v247_v35 = vrot.slane %v246_v33, 1  ;;  %v249_v36 = vsub.f32 %v616_v20, %v241_v32  ;;  %vm336_vm10 = vmor %vm327_vm8, %vm334_vm11 }
 0x1b3   :  { %vm357_vm5 = vmand %vm352_vm12, %vm354_vm13  ;;  %v338_v14 = vsel %vm336_vm10, 1, %v545_v5 }
 0x1b4   :  { %v248_v37 = vmax.f32 %v246_v33, %v247_v35  ;;  %v251_v38 = vmul.f32 1.442695, %v249_v36  ;;  %vm337_vm6 = vmor %vm328_vm14, %vm335_vm15  ;;  %v340_v15 = vadd.s32 %v338_v14, %v317_v12 }
 0x1b5   :  { %vm358_vm4 = vmand %vm353_vm0, %vm354_vm13  ;;  %v339_v16 = vsel %vm337_vm6, 1, %v545_v5 }
 0x1b6   :  { %v250_v40 = vsub.f32 %v620_v23, %v248_v37  ;;  %435 = vpow2.f32 %v251_v38  ;;  %vm359_vm3 = vmor %vm350_vm1, %vm357_vm5  ;;  %v341_v17 = vadd.s32 %v339_v16, %v318_v13 }
 0x1b7   :  { %vm360_vm9 = vmor %vm351_vm7, %vm358_vm4  ;;  %v361_v18 = vsel %vm359_vm3, 1, %v545_v5 }
 0x1b8   :  { %v253_v41 = vmul.f32 1.442695, %v250_v40  ;;  %v363_v20 = vadd.s32 %v361_v18, %v340_v15  ;;  %v362_v22 = vsel %vm360_vm9, 1, %v545_v5 }
 0x1b9   :  { %v364_v24 = vadd.s32 %v362_v22, %v341_v17 }
 0x1ba   :  { %437 = vpow2.f32 %v253_v41  ;;  %vm365_vm8 = vcmp.lt.s32.totalorder %v363_v20, 2 }
 0x1bb   :  { %vm366_vm11 = vcmp.lt.s32.totalorder %v364_v24, 2 }
 0x1c0   :  { %v631_v45 = vpop.eup %435 }
 0x1c1   :  { %v255_v47 = vsel %vm234_vm2, %v631_v45, 0.0 }
 0x1c2   :  { %v256_v49 = vrot.slane %v255_v47, 4 }
 0x1c4   :  { %v644_v52 = vpop.eup %437  ;;  %v257_v53 = vadd.f32 %v256_v49, %v255_v47 }
 0x1c5   :  { %v262_v54 = vsel %vm234_vm2, %v644_v52, 0.0 }
 0x1c6   :  { %v258_v56 = vrot.slane %v257_v53, 2  ;;  %v263_v57 = vrot.slane %v262_v54, 4 }
 0x1c8   :  { %v259_v60 = vadd.f32 %v258_v56, %v257_v53  ;;  %v264_v61 = vadd.f32 %v263_v57, %v262_v54 }
 0x1ca   :  { %v260_v63 = vrot.slane %v259_v60, 1  ;;  %v265_v0 = vrot.slane %v264_v61, 2 }
 0x1cc   :  { %v261_v2 = vadd.f32 %v260_v63, %v259_v60  ;;  %v266_v3 = vadd.f32 %v265_v0, %v264_v61 }
 0x1ce   :  { %v267_v8 = vrot.slane %v266_v3, 1  ;;  %439 = vrcp.f32 %v261_v2 }
 0x1d0   :  { %v268_v11 = vadd.f32 %v267_v8, %v266_v3 }
 0x1d2   :  { %441 = vrcp.f32 %v268_v11 }
 0x1d8   :  { %v440_v19 = vpop.eup %439 }
 0x1d9   :  { %v271_v21 = vmul.f32 %v440_v19, %v631_v45 }
 0x1db   :  { %v367_v23 = vsel %vm365_vm8, %v271_v21, 0.0 }
 0x1dc   :  { %v442_v25 = vpop.eup %441  ;;  %v369_v28 = vsel %vm234_vm2, %v367_v23, 0.0 }
 0x1dd   :  { %v272_v26 = vmul.f32 %v442_v25, %v644_v52 }
 0x1df   :  { %v368_v27 = vsel %vm366_vm11, %v272_v26, 0.0 }
 0x1e0   :  { %v370_v29 = vsel %vm234_vm2, %v368_v27, 0.0 }
 0x1e1   :  { %v371_v30 = vadd.f32 %v370_v29, %v369_v28 }
 0x1e3   :  { %v372_v31 = vadd.f32 1e-06, %v371_v30 }
 0x1e5   :  { %443 = vrcp.f32 %v372_v31 }
 0x1ef   :  { %v444_v32 = vpop.eup %443 }
 0x1f0   :  { %v374_v33 = vmul.f32 2.0, %v444_v32 }
 0x1f2   :  { %v375_v34 = vmul.f32 %v374_v33, %v367_v23  ;;  %v376_v35 = vmul.f32 %v374_v33, %v368_v27 }
 0x1f4   :  { %377 = vst.msk [vmem:[#allocation9] sm:$0xf] %vm234_vm2, %v375_v34  ;;  %378 = vst.msk [vmem:[#allocation9 + $0x4] sm:$0xf] %vm234_vm2, %v376_v35 }
 0x1f5   :  { %522 = shalt.err (!%p519_p0)
}
 0x1f6   :  { %s523_s26 = scalar_lea.hbm %s711_s3, 128 }
 0x1f7   :  { %p524_p1 = scmp.ne.s32.totalorder %s711_s3, %s523_s26  ;;  %p527_p2 = scmp.lt.u32.totalorder %s523_s26, %s711_s3 }
 0x1f9   :  { %p529_p3 = pnand %p527_p2, %p524_p1 }
 0x1fb   :  { %532 = shalt.err (!%p529_p3)
}
 0x1fc   :  { %s547_s4 = smov 64   ;;  %s548_s5 = smov 4  }
 0x1fd   :  { %390 = dma.vmem_to_hbm [thread:$0]  %s385_s22, 128, %s711_s3, [#allocation5], %s547_s4, %s547_s4, %s548_s5  }
 0x1fe   :  { %537 = dma.done.wait [#allocation5], 128  }
 0x1ff   :  { %538 = vsyncadd [#allocation5], 4294967168 }
 0x200   :  { %394 = vsyncpa [#allocation4], 1 }
 0x201   :  { %395 = vsyncpa [#allocation7], 1 }
 0x202   :  { %396 = vsyncpa [#allocation5], 1 }

</bundles_post_ra>
